<compile_context>
chip_gen: v7x
topology: tpu7x:2x2x1
jax: 0.10.0
libtpu: 0.0.40
codegen_flags: <defaults>
</compile_context>

<pallas_src>
import functools

import jax
import jax.numpy as jnp
from jax import lax
from jax.experimental import pallas as pl
from jax.experimental.pallas import tpu as pltpu

NUM_OPS = 5


def _expert_weight_gen_kernel(x_ref, w1_ref, b1_ref, w2_ref, b2_ref, o_ref,
                              acc_ref, *, inv_hw, hw, thw, mask_tail):
    # Grid: (batch tiles [parallel], spatial tiles [arbitrary / reduction]).
    k = pl.program_id(1)

    @pl.when(k == 0)
    def _():
        acc_ref[...] = jnp.zeros_like(acc_ref)

    # Steady state: lane-partial accumulation with plain VPU adds over
    # static 128-lane chunks (no per-step cross-lane XLU reduce / relayout).
    n_chunks = thw // 128
    base = k * thw
    if mask_tail:
        lane = lax.broadcasted_iota(jnp.int32, (1, 1, 128), 2)  # hoisted
    for j in range(n_chunks):
        xj = x_ref[:, :, pl.ds(j * 128, 128)]                   # (TB, C, 128)
        if mask_tail:
            xj = jnp.where(base + (j * 128) + lane < hw, xj, 0.0)
        acc_ref[...] += xj

    @pl.when(k == pl.num_programs(1) - 1)
    def _():
        # Adaptive average pool to 1x1 == mean over the flattened spatial axis.
        pooled = jnp.sum(acc_ref[...], axis=-1) * inv_hw        # (TB, C)

        # Linear 1 + ReLU  (C -> 2*L*NUM_OPS)
        h = jnp.dot(pooled, w1_ref[...],
                    preferred_element_type=jnp.float32) + b1_ref[...]
        h = jnp.maximum(h, 0.0)

        # Linear 2  (2*L*NUM_OPS -> L*NUM_OPS)
        out = jnp.dot(h, w2_ref[...],
                      preferred_element_type=jnp.float32) + b2_ref[...]
        o_ref[...] = out.astype(o_ref.dtype)


def _vmem_capacity_bytes():
    try:
        info = pltpu.get_tpu_info()
        cap = getattr(info, "vmem_capacity_bytes", None)
        if cap:
            return int(cap)
    except Exception:
        pass
    return 64 * 1024 * 1024        # conservative fallback (v7x per-TensorCore)


def expert_weight_gen(x, w1, b1, w2, b2, num_layers):
    """x: (B, C, H, W) float32 -> (B, num_layers, NUM_OPS) float32."""
    B, C, H, W = x.shape
    HW = H * W
    hidden = w1.shape[1]
    out_dim = w2.shape[1]

    vmem_cap = _vmem_capacity_bytes()
    # Per-buffer budget for the streamed x tile (double-buffered by Pallas).
    x_buf_budget = 8 * 1024 * 1024

    # ---- Batch tile -------------------------------------------------------
    if B <= 8:
        TB = B                                       # single full-batch tile
    else:
        tb_budget = max(8, (x_buf_budget // (C * 128 * 4)) // 8 * 8)
        tb_split = max(8, ((B // 2) // 8) * 8)       # >=2 parallel tiles (megacore)
        TB = min(128, tb_budget, tb_split)

    # ---- Spatial tile (lane-aligned multiple of 128) -----------------------
    hw_pad128 = pl.cdiv(HW, 128) * 128
    max_thw = max(128, (x_buf_budget // (TB * C * 4)) // 128 * 128)
    THW = min(hw_pad128, max_thw)
    # Safety clamp: 2 x-buffers + accumulator must provably fit physical VMEM.
    # TODO(synk): for extremely large C, tile C as an extra "arbitrary" axis.
    while THW > 128 and (2 * TB * C * THW * 4 + TB * C * 128 * 4
                         > vmem_cap - (8 << 20)):
        THW -= 128

    grid = (pl.cdiv(B, TB), pl.cdiv(HW, THW))
    mask_tail = (HW % THW) != 0

    # Free view; no padded HBM copy of x.
    x_flat = x.reshape(B, C, HW)

    kernel = functools.partial(
        _expert_weight_gen_kernel,
        inv_hw=1.0 / HW, hw=HW, thw=THW, mask_tail=mask_tail)

    weights_bytes = 4 * (w1.size + b1.size + w2.size + b2.size)
    need = (2 * TB * C * THW * 4 + 2 * weights_bytes
            + TB * C * 128 * 4 + 2 * TB * out_dim * 4)
    vmem_limit = int(min(vmem_cap, max(32 << 20, need + (16 << 20))))

    cost = pl.CostEstimate(
        flops=B * C * HW + 2 * B * C * hidden + 2 * B * hidden * out_dim,
        transcendentals=0,
        bytes_accessed=(x_flat.size + w1.size + b1.size + w2.size + b2.size
                        + B * out_dim) * 4,
    )

    flat_out = pl.pallas_call(
        kernel,
        out_shape=jax.ShapeDtypeStruct((B, out_dim), jnp.float32),
        grid_spec=pltpu.PrefetchScalarGridSpec(
            num_scalar_prefetch=0,
            grid=grid,
            in_specs=[
                pl.BlockSpec((TB, C, THW), lambda i, k: (i, 0, k)),
                pl.BlockSpec(w1.shape, lambda i, k: (0, 0)),
                pl.BlockSpec(b1.shape, lambda i, k: (0, 0)),
                pl.BlockSpec(w2.shape, lambda i, k: (0, 0)),
                pl.BlockSpec(b2.shape, lambda i, k: (0, 0)),
            ],
            out_specs=pl.BlockSpec((TB, out_dim), lambda i, k: (i, 0)),
            scratch_shapes=[pltpu.VMEM((TB, C, 128), jnp.float32)],
        ),
        compiler_params=pltpu.CompilerParams(
            dimension_semantics=("parallel", "arbitrary"),
            vmem_limit_bytes=vmem_limit,
        ),
        cost_estimate=cost,
    )(x_flat, w1, b1, w2, b2)

    return flat_out.reshape(B, num_layers, NUM_OPS)


def init_params(key, inputch, num_layers):
    """Deterministic synthetic parameters (matches nn.Linear shapes)."""
    hidden = num_layers * NUM_OPS * 2
    out = num_layers * NUM_OPS
    k1, k2, k3, k4 = jax.random.split(key, 4)
    # stored transposed vs. torch -> (in, out) so kernel does pooled @ W
    w1 = jax.random.normal(k1, (inputch, hidden), jnp.float32) * 0.05
    b1 = jax.random.normal(k2, (1, hidden), jnp.float32) * 0.05
    w2 = jax.random.normal(k3, (hidden, out), jnp.float32) * 0.05
    b2 = jax.random.normal(k4, (1, out), jnp.float32) * 0.05
    return w1, b1, w2, b2


def _jax_reference(x, w1, b1, w2, b2, num_layers):
    pooled = jnp.mean(x, axis=(2, 3))                           # (B, C)
    ref = jnp.maximum(pooled @ w1 + b1, 0.0) @ w2 + b2
    return ref.reshape(x.shape[0], num_layers, NUM_OPS)


if __name__ == "__main__":
    num_layers = 3
    inputch = 64

    key = jax.random.PRNGKey(0)
    kx, kp, kx2 = jax.random.split(key, 3)
    w1, b1, w2, b2 = init_params(kp, inputch, num_layers)

    # Case 1: module-default-ish shapes (spatial size a multiple of 128).
    B, H, W = 2, 16, 16
    x = jax.random.normal(kx, (B, inputch, H, W), jnp.float32)
    out = jax.block_until_ready(expert_weight_gen(x, w1, b1, w2, b2, num_layers))
    ref = _jax_reference(x, w1, b1, w2, b2, num_layers)
    assert out.shape == (B, num_layers, NUM_OPS)
    assert jnp.allclose(out, ref, atol=1e-4, rtol=1e-4)

    # Case 2: ragged spatial size and B > one batch tile — exercises the
    # in-kernel tail mask and partial batch blocks (no wrapper padding).
    B2, H2, W2 = 10, 15, 15
    x2 = jax.random.normal(kx2, (B2, inputch, H2, W2), jnp.float32)
    out2 = jax.block_until_ready(expert_weight_gen(x2, w1, b1, w2, b2, num_layers))
    ref2 = _jax_reference(x2, w1, b1, w2, b2, num_layers)
    assert out2.shape == (B2, num_layers, NUM_OPS)
    assert jnp.allclose(out2, ref2, atol=1e-4, rtol=1e-4)

    print("KERNEL_OK")
</pallas_src>

<mosaic_0001>
module attributes {stable_mosaic.version = 11 : i64} {
  func.func @_expert_weight_gen_kernel(%arg0: i32, %arg1: i32, %arg2: memref<2x64x256xf32, #tpu.memory_space<vmem>>, %arg3: memref<64x30xf32, #tpu.memory_space<vmem>>, %arg4: memref<1x30xf32, #tpu.memory_space<vmem>>, %arg5: memref<30x15xf32, #tpu.memory_space<vmem>>, %arg6: memref<1x15xf32, #tpu.memory_space<vmem>>, %arg7: memref<2x15xf32, #tpu.memory_space<vmem>>, %arg8: memref<2x64x128xf32, #tpu.memory_space<vmem>>) attributes {dimension_semantics = [#tpu.dimension_semantics<parallel>, #tpu.dimension_semantics<arbitrary>], iteration_bounds = array<i64: 1, 1>, scalar_prefetch = 0 : i64, scratch_operands = 1 : i64, tpu.core_type = #tpu.core_type<tc>, window_params = [{transform_indices = @transform_0, window_bounds = array<i64: 2, 64, 256>}, {pipeline_mode = #tpu.pipeline_mode<synchronous>, transform_indices = @transform_1, window_bounds = array<i64: 64, 30>}, {pipeline_mode = #tpu.pipeline_mode<synchronous>, transform_indices = @transform_2, window_bounds = array<i64: 1, 30>}, {pipeline_mode = #tpu.pipeline_mode<synchronous>, transform_indices = @transform_3, window_bounds = array<i64: 30, 15>}, {pipeline_mode = #tpu.pipeline_mode<synchronous>, transform_indices = @transform_4, window_bounds = array<i64: 1, 15>}, {transform_indices = @transform_5, window_bounds = array<i64: 2, 15>}]} {
    %c0_i32 = arith.constant 0 : i32
    %0 = arith.cmpi eq, %arg1, %c0_i32 : i32
    %1 = arith.extui %0 : i1 to i32
    %c0_i32_0 = arith.constant 0 : i32
    %2 = arith.cmpi ne, %1, %c0_i32_0 : i32
    scf.if %2 {
      %cst = arith.constant 0.000000e+00 : f32
      %14 = vector.broadcast %cst : f32 to vector<2x64x128xf32>
      %c0_19 = arith.constant 0 : index
      %c0_20 = arith.constant 0 : index
      %c0_21 = arith.constant 0 : index
      %15 = vector.load %arg8[%c0_19, %c0_20, %c0_21] : memref<2x64x128xf32, #tpu.memory_space<vmem>>, vector<2x64x128xf32>
      tpu.vector_store %arg8[%c0_19, %c0_20, %c0_21], %14 {strides = array<i32>} : memref<2x64x128xf32, #tpu.memory_space<vmem>>, vector<2x64x128xf32>,
    } else {
    }
    %c0 = arith.constant 0 : index
    %c0_1 = arith.constant 0 : index
    %c0_2 = arith.constant 0 : index
    %3 = vector.load %arg2[%c0, %c0_1, %c0_2] : memref<2x64x256xf32, #tpu.memory_space<vmem>>, vector<2x64x128xf32>
    %c0_3 = arith.constant 0 : index
    %c0_4 = arith.constant 0 : index
    %c0_5 = arith.constant 0 : index
    %4 = vector.load %arg8[%c0_3, %c0_4, %c0_5] : memref<2x64x128xf32, #tpu.memory_space<vmem>>, vector<2x64x128xf32>
    %5 = arith.addf %4, %3 : vector<2x64x128xf32>
    %c0_6 = arith.constant 0 : index
    %c0_7 = arith.constant 0 : index
    %c0_8 = arith.constant 0 : index
    %6 = vector.load %arg8[%c0_6, %c0_7, %c0_8] : memref<2x64x128xf32, #tpu.memory_space<vmem>>, vector<2x64x128xf32>
    tpu.vector_store %arg8[%c0_6, %c0_7, %c0_8], %5 {strides = array<i32>} : memref<2x64x128xf32, #tpu.memory_space<vmem>>, vector<2x64x128xf32>,
    %c0_9 = arith.constant 0 : index
    %c0_10 = arith.constant 0 : index
    %c128 = arith.constant 128 : index
    %7 = vector.load %arg2[%c0_9, %c0_10, %c128] : memref<2x64x256xf32, #tpu.memory_space<vmem>>, vector<2x64x128xf32>
    %c0_11 = arith.constant 0 : index
    %c0_12 = arith.constant 0 : index
    %c0_13 = arith.constant 0 : index
    %8 = vector.load %arg8[%c0_11, %c0_12, %c0_13] : memref<2x64x128xf32, #tpu.memory_space<vmem>>, vector<2x64x128xf32>
    %9 = arith.addf %8, %7 : vector<2x64x128xf32>
    %c0_14 = arith.constant 0 : index
    %c0_15 = arith.constant 0 : index
    %c0_16 = arith.constant 0 : index
    %10 = vector.load %arg8[%c0_14, %c0_15, %c0_16] : memref<2x64x128xf32, #tpu.memory_space<vmem>>, vector<2x64x128xf32>
    tpu.vector_store %arg8[%c0_14, %c0_15, %c0_16], %9 {strides = array<i32>} : memref<2x64x128xf32, #tpu.memory_space<vmem>>, vector<2x64x128xf32>,
    %c0_i32_17 = arith.constant 0 : i32
    %11 = arith.cmpi eq, %arg1, %c0_i32_17 : i32
    %12 = arith.extui %11 : i1 to i32
    %c0_i32_18 = arith.constant 0 : i32
    %13 = arith.cmpi ne, %12, %c0_i32_18 : i32
    scf.if %13 {
      %c0_19 = arith.constant 0 : index
      %c0_20 = arith.constant 0 : index
      %c0_21 = arith.constant 0 : index
      %14 = vector.load %arg8[%c0_19, %c0_20, %c0_21] : memref<2x64x128xf32, #tpu.memory_space<vmem>>, vector<2x64x128xf32>
      %cst = arith.constant dense<0.000000e+00> : vector<2x64xf32>
      %15 = vector.multi_reduction <add>, %14, %cst [2] : vector<2x64x128xf32> to vector<2x64xf32>
      %cst_22 = arith.constant 3.906250e-03 : f32
      %16 = vector.broadcast %cst_22 : f32 to vector<2x64xf32>
      %17 = arith.mulf %15, %16 : vector<2x64xf32>
      %c0_23 = arith.constant 0 : index
      %c0_24 = arith.constant 0 : index
      %18 = vector.load %arg3[%c0_23, %c0_24] : memref<64x30xf32, #tpu.memory_space<vmem>>, vector<64x30xf32>
      %cst_25 = arith.constant dense<0.000000e+00> : vector<2x30xf32>
      %19 = tpu.matmul %17, %18, %cst_25 {dimension_numbers = #tpu.dot_dimension_numbers<[1], [0], [0], [1], [0, 0, 1, 1], [], []>} : vector<2x64xf32>, vector<64x30xf32>, vector<2x30xf32> -> vector<2x30xf32>
      %c0_26 = arith.constant 0 : index
      %c0_27 = arith.constant 0 : index
      %20 = vector.load %arg4[%c0_26, %c0_27] : memref<1x30xf32, #tpu.memory_space<vmem>>, vector<1x30xf32>
      %21 = vector.broadcast %20 : vector<1x30xf32> to vector<2x30xf32>
      %22 = arith.addf %19, %21 : vector<2x30xf32>
      %cst_28 = arith.constant 0.000000e+00 : f32
      %23 = vector.broadcast %cst_28 : f32 to vector<2x30xf32>
      %24 = arith.maximumf %22, %23 : vector<2x30xf32>
      %c0_29 = arith.constant 0 : index
      %c0_30 = arith.constant 0 : index
      %25 = vector.load %arg5[%c0_29, %c0_30] : memref<30x15xf32, #tpu.memory_space<vmem>>, vector<30x15xf32>
      %cst_31 = arith.constant dense<0.000000e+00> : vector<2x15xf32>
      %26 = tpu.matmul %24, %25, %cst_31 {dimension_numbers = #tpu.dot_dimension_numbers<[1], [0], [0], [1], [0, 0, 1, 1], [], []>} : vector<2x30xf32>, vector<30x15xf32>, vector<2x15xf32> -> vector<2x15xf32>
      %c0_32 = arith.constant 0 : index
      %c0_33 = arith.constant 0 : index
      %27 = vector.load %arg6[%c0_32, %c0_33] : memref<1x15xf32, #tpu.memory_space<vmem>>, vector<1x15xf32>
      %28 = vector.broadcast %27 : vector<1x15xf32> to vector<2x15xf32>
      %29 = arith.addf %26, %28 : vector<2x15xf32>
      %c0_34 = arith.constant 0 : index
      %c0_35 = arith.constant 0 : index
      %30 = vector.load %arg7[%c0_34, %c0_35] : memref<2x15xf32, #tpu.memory_space<vmem>>, vector<2x15xf32>
      tpu.vector_store %arg7[%c0_34, %c0_35], %29 {strides = array<i32>} : memref<2x15xf32, #tpu.memory_space<vmem>>, vector<2x15xf32>,
    } else {
    }
    return
  }
  func.func @transform_0(%arg0: i32, %arg1: i32) -> (i32, i32, i32) {
    %c0_i32 = arith.constant 0 : i32
    %c0_i32_0 = arith.constant 0 : i32
    return %arg0, %c0_i32, %arg1 : i32, i32, i32
  }
  func.func @transform_1(%arg0: i32, %arg1: i32) -> (i32, i32) {
    %c0_i32 = arith.constant 0 : i32
    %c0_i32_0 = arith.constant 0 : i32
    %c0_i32_1 = arith.constant 0 : i32
    return %c0_i32, %c0_i32_0 : i32, i32
  }
  func.func @transform_2(%arg0: i32, %arg1: i32) -> (i32, i32) {
    %c0_i32 = arith.constant 0 : i32
    %c0_i32_0 = arith.constant 0 : i32
    %c0_i32_1 = arith.constant 0 : i32
    return %c0_i32, %c0_i32_0 : i32, i32
  }
  func.func @transform_3(%arg0: i32, %arg1: i32) -> (i32, i32) {
    %c0_i32 = arith.constant 0 : i32
    %c0_i32_0 = arith.constant 0 : i32
    %c0_i32_1 = arith.constant 0 : i32
    return %c0_i32, %c0_i32_0 : i32, i32
  }
  func.func @transform_4(%arg0: i32, %arg1: i32) -> (i32, i32) {
    %c0_i32 = arith.constant 0 : i32
    %c0_i32_0 = arith.constant 0 : i32
    %c0_i32_1 = arith.constant 0 : i32
    return %c0_i32, %c0_i32_0 : i32, i32
  }
  func.func @transform_5(%arg0: i32, %arg1: i32) -> (i32, i32) {
    %c0_i32 = arith.constant 0 : i32
    %c0_i32_0 = arith.constant 0 : i32
    return %arg0, %c0_i32 : i32, i32
  }
}

</mosaic_0001>

<bundles_post_ra>
// kernel: tpu_custom_call.1
= control target key start
LH: loop header
LB: loop body
LE: loop exit
PB: predicated region body
PF: predicated region fallthrough
CT: control target
= control target key end

     0   :  { %10 = vsyncpa [#allocation4], 0  ;;  %s797_s0 = inlined_call_operand.hbm [shape: f32[2,64,256], index: 0, kind: input, shape index: {}]   ;;  %s798_s1 = inlined_call_operand.vmem [shape: f32[64,30], index: 1, kind: input, shape index: {}]   ;;  %s799_s2 = inlined_call_operand.vmem [shape: f32[1,30], index: 2, kind: input, shape index: {}]   ;;  %s800_s3 = inlined_call_operand.vmem [shape: f32[30,15], index: 3, kind: input, shape index: {}]   ;;  %s801_s4 = inlined_call_operand.vmem [shape: f32[1,15], index: 4, kind: input, shape index: {}]   ;;  %s802_s5 = inlined_call_operand.hbm [shape: f32[2,15], index: 5, kind: output, shape index: {}]  }
   0x1   :  { %11 = vsyncpa [#allocation5], 0  ;;  %s681_s18 = smov [#allocation3]   ;;  %s633_s22 = scalar_lea.hbm %s797_s0, 4096 }
   0x2   :  { %s17_s19 = sshll.u32 %s681_s18, 4  ;;  %p634_p0 = scmp.ne.s32.totalorder %s797_s0, %s633_s22  ;;  %s18_s19 = int_to_ptr.vmem [resolvable:$true] %s17_s19 }
   0x3   :  { %p637_p1 = scmp.lt.u32.totalorder %s633_s22, %s797_s0 }
   0x5   :  { %p639_p2 = pnand %p637_p1, %p634_p0 }
   0x7   :  { %642 = shalt.err (!%p639_p2)
}
   0x8   :  { %s643_s27 = scalar_lea.vmem %s18_s19, 4096  ;;  %p648_p4 = scmp.lt.s32.totalorder %s18_s19, %s18_s19 }
   0x9   :  { %p644_p3 = scmp.ne.s32.totalorder %s18_s19, %s643_s27  ;;  %p649_p5 = scmp.lt.s32.totalorder %s643_s27, %s643_s27 }
   0xb   :  { %p650_p6 = por %p649_p5, %p648_p4 }
   0xd   :  { %p651_p7 = pnand %p650_p6, %p644_p3 }
   0xf   :  { %654 = shalt.err (!%p651_p7)
}
  0x10   :  { %s682_s28 = smov 256   ;;  %s683_s29 = smov 16  }
  0x11   :  { %23 = dma.hbm_to_vmem [thread:$0]  %s797_s0, 4096, %s18_s19, [#allocation4], %s682_s28, %s682_s28, %s683_s29  }
  0x12   :  { %677 = dma.done.wait [#allocation4], 4096  }
  0x13   :  { %678 = vsyncadd [#allocation4], 4294963200  ;;  %v63_v0 = vld [vmem:[#allocation3 + $0x80] sm:$0xff]  ;;  %v127_v1 = vld [vmem:[#allocation3 + $0x88] sm:$0xff]  ;;  %v684_v51 = vmov 0.0|0.0   ;;  %vm685_vm0 = vmmov 0  }
  0x14   :  { %v55_v2 = vld [vmem:[#allocation3] sm:$0xff]  ;;  %v159_v3 = vadd.f32 %v127_v1, %v63_v0  ;;  %v119_v4 = vld [vmem:[#allocation3 + $0x8] sm:$0xff]  ;;  %v64_v5 = vld [vmem:[#allocation3 + $0x90] sm:$0xff]  ;;  %606 = vmatprep.subr.bf16.mxu0 %v684_v51  ;;  %618 = vmatprep.subr.bf16.mxu1 %v684_v51  ;;  %v686_v61 = vmov 0.0   ;;  %vm292_vm1 = vcmask 130112   ;;  %vm299_vm2 = vcmask 195712  }
  0x15   :  { %v128_v6 = vld [vmem:[#allocation3 + $0x98] sm:$0xff]  ;;  %v151_v7 = vadd.f32 %v119_v4, %v55_v2  ;;  %v56_v8 = vld [vmem:[#allocation3 + $0x10] sm:$0xff]  ;;  %v65_v12 = vld [vmem:[#allocation3 + $0xa0] sm:$0xff]  ;;  %592 = vmatprep.mubr.msk.f32.mxu0 %vm685_vm0, %v686_v61  ;;  %603 = vmatprep.mubr.msk.f32.mxu1 %vm685_vm0, %v686_v61  ;;  %vm306_vm3 = vcmask 261312   ;;  %vm313_vm4 = vcmask 326912   ;;  %vm320_vm5 = vcmask 392512  }
  0x16   :  { %v120_v9 = vld [vmem:[#allocation3 + $0x18] sm:$0xff]  ;;  %218 = vadd.xlane.f32.xlu1 %v159_v3  ;;  %v160_v10 = vadd.f32 %v128_v6, %v64_v5  ;;  %v129_v13 = vld [vmem:[#allocation3 + $0xa8] sm:$0xff]  ;;  %v57_v14 = vld [vmem:[#allocation3 + $0x20] sm:$0xff]  ;;  %v281_v5 = vlaneseq  ;;  %vm327_vm6 = vcmask 458112   ;;  %vm334_vm7 = vcmask 523712  }
  0x17   :  { %202 = vadd.xlane.f32.xlu0 %v151_v7  ;;  %v152_v11 = vadd.f32 %v120_v9, %v56_v8  ;;  %v121_v15 = vld [vmem:[#allocation3 + $0x28] sm:$0xff]  ;;  %v161_v16 = vadd.f32 %v129_v13, %v65_v12  ;;  %v66_v18 = vld [vmem:[#allocation3 + $0xb0] sm:$0xff]  ;;  %v130_v19 = vld [vmem:[#allocation3 + $0xb8] sm:$0xff]  ;;  %vm375_vm8 = vcmask 1041409   ;;  %vm377_vm9 = vcmask 523264  }
  0x18   :  { %v153_v17 = vadd.f32 %v121_v15, %v57_v14  ;;  %v58_v20 = vld [vmem:[#allocation3 + $0x30] sm:$0xff]  ;;  %v122_v21 = vld [vmem:[#allocation3 + $0x38] sm:$0xff]  ;;  %v162_v22 = vadd.f32 %v130_v19, %v66_v18  ;;  %v67_v24 = vld [vmem:[#allocation3 + $0xc0] sm:$0xff]  ;;  %v282_v8 = vand.u32 127, %v281_v5  ;;  %vm466_vm10 = vcmask 1045504  }
  0x19   :  { %v154_v23 = vadd.f32 %v122_v21, %v58_v20  ;;  %v131_v25 = vld [vmem:[#allocation3 + $0xc8] sm:$0xff]  ;;  %v59_v26 = vld [vmem:[#allocation3 + $0x40] sm:$0xff]  ;;  %v68_v30 = vld [vmem:[#allocation3 + $0xd0] sm:$0xff]  ;;  %vm687_vm11 = vmmov 1   ;;  %vm462_vm13 = vcmask 244736   ;;  %vm540_vm14 = vcmask 115712  }
  0x1a   :  { %220 = vadd.xlane.f32.xlu1 %v160_v10  ;;  %v123_v27 = vld [vmem:[#allocation3 + $0x48] sm:$0xff]  ;;  %v163_v28 = vadd.f32 %v131_v25, %v67_v24  ;;  %v132_v31 = vld [vmem:[#allocation3 + $0xd8] sm:$0xff]  ;;  %v60_v32 = vld [vmem:[#allocation3 + $0x50] sm:$0xff]  ;;  %v284_v10 = vshrl.u32 %v281_v5, 7  ;;  %v287_v12 = vadd.s32 4294967288, %v282_v8  ;;  %v294_v13 = vadd.s32 4294967280, %v282_v8 }
  0x1b   :  { %204 = vadd.xlane.f32.xlu0 %v152_v11  ;;  %v155_v29 = vadd.f32 %v123_v27, %v59_v26  ;;  %v124_v33 = vld [vmem:[#allocation3 + $0x58] sm:$0xff]  ;;  %v164_v34 = vadd.f32 %v132_v31, %v68_v30  ;;  %v69_v36 = vld [vmem:[#allocation3 + $0xe0] sm:$0xff]  ;;  %v133_v37 = vld [vmem:[#allocation3 + $0xe8] sm:$0xff]  ;;  %v301_v14 = vadd.s32 4294967272, %v282_v8  ;;  %v308_v15 = vadd.s32 4294967264, %v282_v8 }
  0x1c   :  { %v156_v35 = vadd.f32 %v124_v33, %v60_v32  ;;  %v61_v38 = vld [vmem:[#allocation3 + $0x60] sm:$0xff]  ;;  %v125_v39 = vld [vmem:[#allocation3 + $0x68] sm:$0xff]  ;;  %v165_v40 = vadd.f32 %v133_v37, %v69_v36  ;;  %v70_v42 = vld [vmem:[#allocation3 + $0xf0] sm:$0xff]  ;;  %v285_v18 = vsub.s32 %v282_v8, %v284_v10  ;;  %v290_v20 = vsub.s32 %v287_v12, %v284_v10 }
  0x1d   :  { %v157_v41 = vadd.f32 %v125_v39, %v61_v38  ;;  %v134_v43 = vld [vmem:[#allocation3 + $0xf8] sm:$0xff]  ;;  %v62_v44 = vld [vmem:[#allocation3 + $0x70] sm:$0xff]  ;;  %v250_v48 = vld [vmem:[%s798_s1] sm:$0xff]  ;;  %v297_v21 = vsub.s32 %v294_v13, %v284_v10  ;;  %v304_v24 = vsub.s32 %v301_v14, %v284_v10  ;;  %v311_v25 = vsub.s32 %v308_v15, %v284_v10 }
  0x1e   :  { %222 = vadd.xlane.f32.xlu1 %v161_v16  ;;  %v126_v45 = vld [vmem:[#allocation3 + $0x78] sm:$0xff]  ;;  %v166_v46 = vadd.f32 %v134_v43, %v70_v42  ;;  %v251_v49 = vld [vmem:[%s798_s1 + $0x8] sm:$0xff]  ;;  %v252_v52 = vld [vmem:[%s798_s1 + $0x10] sm:$0xff] }
  0x1f   :  { %206 = vadd.xlane.f32.xlu0 %v153_v17  ;;  %v158_v47 = vadd.f32 %v126_v45, %v62_v44  ;;  %v607_v50 = vpack.c.bf16 %v251_v49, %v250_v48  ;;  %v253_v53 = vld [vmem:[%s798_s1 + $0x18] sm:$0xff]  ;;  %v254_v55 = vld [vmem:[%s798_s1 + $0x20] sm:$0xff]  ;;  %v255_v56 = vld [vmem:[%s798_s1 + $0x28] sm:$0xff]  ;;  %v315_v17 = vadd.s32 4294967256, %v282_v8 }
  0x20   :  { %v610_v54 = vpack.c.bf16 %v253_v53, %v252_v52  ;;  %v613_v57 = vpack.c.bf16 %v255_v56, %v254_v55  ;;  %v256_v58 = vld [vmem:[%s798_s1 + $0x30] sm:$0xff]  ;;  %v257_v59 = vld [vmem:[%s798_s1 + $0x38] sm:$0xff]  ;;  %v451_v62 = vld [vmem:[%s800_s3] sm:$0xff] }
  0x21   :  { %608 = vmatpush3.bf16.msra.mxu0 %v607_v50  ;;  %v616_v60 = vpack.c.bf16 %v257_v59, %v256_v58  ;;  %v452_v63 = vld [vmem:[%s800_s3 + $0x8] sm:$0xff]  ;;  %vm623_vm12 = vmpackc.low %vm466_vm10, %vm687_vm11 }
  0x22   :  { %224 = vadd.xlane.f32.xlu1 %v162_v22  ;;  %609 = vmatprep.subr.bf16.mxu0 %v684_v51  ;;  %v619_v0 = vpack.c.bf16 %v452_v63, %v451_v62  ;;  %v322_v22 = vadd.s32 4294967248, %v282_v8 }
  0x23   :  { %208 = vadd.xlane.f32.xlu0 %v154_v23 }
  0x24   :  { %620 = vmatpush3.bf16.msra.mxu1 %v619_v0  ;;  %v325_v37 = vsub.s32 %v322_v22, %v284_v10 }
  0x25   :  { %611 = vmatpush3.bf16.msra.mxu0 %v610_v54  ;;  %621 = vmatprep.subr.bf16.mxu1 %v684_v51 }
  0x26   :  { %226 = vadd.xlane.f32.xlu1 %v163_v28  ;;  %612 = vmatprep.subr.bf16.mxu0 %v684_v51  ;;  %v318_v28 = vsub.s32 %v315_v17, %v284_v10 }
  0x27   :  { %210 = vadd.xlane.f32.xlu0 %v155_v29 }
  0x29   :  { %614 = vmatpush3.bf16.msra.mxu0 %v613_v57 }
  0x2a   :  { %228 = vadd.xlane.f32.xlu1 %v164_v34  ;;  %615 = vmatprep.subr.bf16.mxu0 %v684_v51 }
  0x2b   :  { %212 = vadd.xlane.f32.xlu0 %v156_v35 }
  0x2d   :  { %617 = vmatpush3.bf16.msra.mxu0 %v616_v60 }
  0x2e   :  { %230 = vadd.xlane.f32.xlu1 %v165_v40 }
  0x2f   :  { %214 = vadd.xlane.f32.xlu0 %v157_v41  ;;  %v329_v41 = vadd.s32 4294967240, %v282_v8 }
  0x31   :  { %v332_v58 = vsub.s32 %v329_v41, %v284_v10 }
  0x32   :  { %232 = vadd.xlane.f32.xlu1 %v166_v46 }
  0x33   :  { %216 = vadd.xlane.f32.xlu0 %v158_v47 }
  0xa3   :  { %v219_v1 = vpop.xlane.xlu1 %218 }
  0xa4   :  { %v203_v2 = vpop.xlane.xlu0 %202  ;;  %v242_v30 = vmul.f32 0.00390625, %v219_v1 }
  0xa5   :  { %v234_v34 = vmul.f32 0.00390625, %v203_v2 }
  0xa6   :  { %v339_v46 = vrot.slane %v242_v30, %v285_v18 }
  0xa7   :  { %v221_v3 = vpop.xlane.xlu1 %220  ;;  %v286_v51 = vrot.slane %v234_v34, %v285_v18  ;;  %v453_v18 = vld [vmem:[%s800_s3 + $0x10] sm:$0xff] }
  0xa8   :  { %v205_v4 = vpop.xlane.xlu0 %204  ;;  %v243_v23 = vmul.f32 0.00390625, %v221_v3 }
  0xa9   :  { %v235_v26 = vmul.f32 0.00390625, %v205_v4 }
  0xaa   :  { %v343_v38 = vrot.slane %v243_v23, %v290_v20 }
  0xab   :  { %v223_v6 = vpop.xlane.xlu1 %222  ;;  %v291_v42 = vrot.slane %v235_v26, %v290_v20  ;;  %v559_v26 = vld [vmem:[%s801_s4] ss:$0 sm:$0xff] }
  0xac   :  { %v207_v7 = vpop.xlane.xlu0 %206  ;;  %v244_v27 = vmul.f32 0.00390625, %v223_v6  ;;  %v344_v55 = vsel %vm292_vm1, %v343_v38, %v339_v46 }
  0xad   :  { %v236_v31 = vmul.f32 0.00390625, %v207_v7  ;;  %v293_v59 = vsel %vm292_vm1, %v291_v42, %v286_v51 }
  0xae   :  { %v348_v43 = vrot.slane %v244_v27, %v297_v21 }
  0xaf   :  { %v225_v9 = vpop.xlane.xlu1 %224  ;;  %v298_v47 = vrot.slane %v236_v31, %v297_v21  ;;  %v557_v21 = vld [vmem:[%s799_s2] ss:$0 sm:$0xff] }
  0xb0   :  { %v209_v11 = vpop.xlane.xlu0 %208  ;;  %v245_v32 = vmul.f32 0.00390625, %v225_v9  ;;  %v349_v60 = vsel %vm299_vm2, %v348_v43, %v344_v55 }
  0xb1   :  { %v237_v35 = vmul.f32 0.00390625, %v209_v11  ;;  %v300_v0 = vsel %vm299_vm2, %v298_v47, %v293_v59 }
  0xb2   :  { %v353_v48 = vrot.slane %v245_v32, %v304_v24 }
  0xb3   :  { %v227_v16 = vpop.xlane.xlu1 %226  ;;  %v305_v52 = vrot.slane %v237_v35, %v304_v24 }
  0xb4   :  { %v211_v19 = vpop.xlane.xlu0 %210  ;;  %v246_v36 = vmul.f32 0.00390625, %v227_v16  ;;  %v354_v1 = vsel %vm306_vm3, %v353_v48, %v349_v60 }
  0xb5   :  { %v238_v39 = vmul.f32 0.00390625, %v211_v19  ;;  %v307_v5 = vsel %vm306_vm3, %v305_v52, %v300_v0  ;;  %v454_v19 = vld [vmem:[%s800_s3 + $0x18] sm:$0x3f]  ;;  %s688_s3 = smov [#allocation6]  }
  0xb6   :  { %v358_v53 = vrot.slane %v246_v36, %v311_v25  ;;  %v622_v20 = vpack.c.bf16 %v454_v19, %v453_v18  ;;  %s548_s7 = sshll.u32 %s688_s3, 4  ;;  %s549_s7 = int_to_ptr.vmem [resolvable:$true] %s548_s7 }
  0xb7   :  { %v229_v29 = vpop.xlane.xlu1 %228  ;;  %v312_v56 = vrot.slane %v238_v39, %v311_v25  ;;  %s655_s8 = scalar_lea.vmem %s549_s7, 32  ;;  %p660_p9 = scmp.lt.s32.totalorder %s549_s7, %s549_s7 }
  0xb8   :  { %v213_v33 = vpop.xlane.xlu0 %212  ;;  %v247_v40 = vmul.f32 0.00390625, %v229_v29  ;;  %v359_v6 = vsel %vm313_vm4, %v358_v53, %v354_v1  ;;  %624 = vmatpush3.bf16.msk.msra.mxu1 %vm623_vm12, %v622_v20  ;;  %p656_p8 = scmp.ne.s32.totalorder %s549_s7, %s655_s8  ;;  %p661_p10 = scmp.lt.s32.totalorder %s655_s8, %s655_s8 }
  0xb9   :  { %v239_v44 = vmul.f32 0.00390625, %v213_v33  ;;  %v314_v8 = vsel %vm313_vm4, %v312_v56, %v307_v5 }
  0xba   :  { %v363_v57 = vrot.slane %v247_v40, %v318_v28  ;;  %p662_p11 = por %p661_p10, %p660_p9 }
  0xbb   :  { %v231_v45 = vpop.xlane.xlu1 %230  ;;  %v319_v61 = vrot.slane %v239_v44, %v318_v28 }
  0xbc   :  { %v248_v49 = vmul.f32 0.00390625, %v231_v45  ;;  %v215_v50 = vpop.xlane.xlu0 %214  ;;  %v364_v9 = vsel %vm320_vm5, %v363_v57, %v359_v6  ;;  %p663_p12 = pnand %p662_p11, %p656_p8 }
  0xbd   :  { %v240_v54 = vmul.f32 0.00390625, %v215_v50  ;;  %v321_v11 = vsel %vm320_vm5, %v319_v61, %v314_v8 }
  0xbe   :  { %v368_v62 = vrot.slane %v248_v49, %v325_v37 }
  0xbf   :  { %v233_v63 = vpop.xlane.xlu1 %232  ;;  %v326_v2 = vrot.slane %v240_v54, %v325_v37 }
  0xc0   :  { %v249_v3 = vmul.f32 0.00390625, %v233_v63  ;;  %v217_v4 = vpop.xlane.xlu0 %216  ;;  %v369_v12 = vsel %vm327_vm6, %v368_v62, %v364_v9 }
  0xc1   :  { %v241_v7 = vmul.f32 0.00390625, %v217_v4  ;;  %v328_v14 = vsel %vm327_vm6, %v326_v2, %v321_v11 }
  0xc2   :  { %v373_v10 = vrot.slane %v249_v3, %v332_v58 }
  0xc3   :  { %v333_v13 = vrot.slane %v241_v7, %v332_v58 }
  0xc4   :  { %v374_v15 = vsel %vm334_vm7, %v373_v10, %v369_v12 }
  0xc5   :  { %v335_v16 = vsel %vm334_vm7, %v333_v13, %v328_v14 }
  0xc6   :  { %v376_v17 = vsel %vm375_vm8, %v374_v15, %v335_v16 }
  0xc7   :  { %593 = vmatmul.mubr.msk.f32.vlgmr.msra.gmra.mrb[0].mxu0 %vm377_vm9, %v376_v17 }
 0x19a   :  { %v446_v22 = vpop.f32.mrb[0].mxu0 }
 0x19b   :  { %v447_v23 = vadd.f32 %v557_v21, %v446_v22  ;;  %v594_v24 = vpop.f32.mrb[1].mxu0 }
 0x19d   :  { %v450_v25 = vmax.f32 %v447_v23, 0.0 }
 0x19f   :  { %604 = vmatmul.mubr.msk.f32.vlgmr.msra.gmra.mrb[0].mxu1 %vm462_vm13, %v450_v25 }
 0x272   :  { %v536_v27 = vpop.f32.mrb[0].mxu1 }
 0x273   :  { %v537_v28 = vadd.f32 %v559_v26, %v536_v27  ;;  %v605_v29 = vpop.f32.mrb[1].mxu1 }
 0x275   :  { %541 = vst.msk [vmem:[#allocation6] sm:$0x3] %vm540_vm14, %v537_v28 }
 0x276   :  { %666 = shalt.err (!%p663_p12)
}
 0x277   :  { %s667_s10 = scalar_lea.hbm %s802_s5, 32 }
 0x278   :  { %p668_p13 = scmp.ne.s32.totalorder %s802_s5, %s667_s10  ;;  %p671_p0 = scmp.lt.u32.totalorder %s667_s10, %s802_s5 }
 0x27a   :  { %p673_p1 = pnand %p671_p0, %p668_p13 }
 0x27c   :  { %676 = shalt.err (!%p673_p1)
}
 0x27d   :  { %551 = dma.vmem_to_hbm [thread:$0]  %s549_s7, 32, %s802_s5, [#allocation5]  }
 0x27e   :  { %679 = dma.done.wait [#allocation5], 32  }
 0x27f   :  { %680 = vsyncadd [#allocation5], 4294967264 }
 0x280   :  { %555 = vsyncpa [#allocation4], 1 }
 0x281   :  { %556 = vsyncpa [#allocation5], 1 }

</bundles_post_ra>
